<compile_context>
chip_gen: v5e
topology: v5e:2x2
jax: 0.10.0
libtpu: 0.0.40
codegen_flags: <defaults>
</compile_context>

<pallas_src>
import jax
import jax.numpy as jnp
from jax import lax
from jax.experimental import pallas as pl
from jax.experimental.pallas import tpu as pltpu

EPS = 1e-5
NEG_SLOPE = 0.1

D_IN = 1024       # input features (from the shared discriminator layers)
D_HID = 128       # fc / batch_norm features
N_CAT = 10        # categorical logits
N_MEAN = 2        # continuous-code means
N_VAR = 2         # continuous-code variances
HEAD_PAD = 128    # lane-dense packed head width (>= N_CAT + N_MEAN + N_VAR)


# ----------------------------------------------------------------------------
# Fused kernel: Linear(1024->128, no bias) -> BatchNorm1d -> LeakyReLU(0.1)
#               -> packed heads matmul (+bias) -> exp on the variance columns.
# Single grid step; all operands fit in VMEM (fc weight is only 512 KiB).
# ----------------------------------------------------------------------------
def _recognition_kernel(x_ref, wfc_ref, g_ref, b_ref, wh_ref, bh_ref, o_ref):
    # fc (no bias)
    y = jnp.dot(x_ref[...], wfc_ref[...], preferred_element_type=jnp.float32)

    # BatchNorm1d, training mode: per-feature batch mean / biased variance.
    mu = jnp.mean(y, axis=0, keepdims=True)
    var = jnp.mean((y - mu) ** 2, axis=0, keepdims=True)
    y = (y - mu) * lax.rsqrt(var + EPS) * g_ref[...] + b_ref[...]

    # LeakyReLU(negative_slope=0.1): max(x, 0.1*x)
    y = jnp.maximum(y, NEG_SLOPE * y)

    # Packed heads: columns [0:10]=digits, [10:12]=mean, [12:14]=log-var-ish,
    # [14:128]=zero padding (lane-dense single matmul + unmasked store).
    h = jnp.dot(y, wh_ref[...], preferred_element_type=jnp.float32) + bh_ref[...]

    # exp only on the variance columns (EUP op; other columns pass through).
    col = lax.broadcasted_iota(jnp.int32, h.shape, 1)
    is_var = (col >= N_CAT + N_MEAN) & (col < N_CAT + N_MEAN + N_VAR)
    o_ref[...] = jnp.where(is_var, jnp.exp(h), h)


def _recognition_pallas(x, w_fc, gamma, beta, w_heads, b_heads):
    B = x.shape[0]
    return pl.pallas_call(
        _recognition_kernel,
        out_shape=jax.ShapeDtypeStruct((B, HEAD_PAD), jnp.float32),
        grid=(1,),
        in_specs=[
            pl.BlockSpec((B, D_IN), lambda i: (0, 0)),
            pl.BlockSpec((D_IN, D_HID), lambda i: (0, 0)),
            pl.BlockSpec((1, D_HID), lambda i: (0, 0)),
            pl.BlockSpec((1, D_HID), lambda i: (0, 0)),
            pl.BlockSpec((D_HID, HEAD_PAD), lambda i: (0, 0)),
            pl.BlockSpec((1, HEAD_PAD), lambda i: (0, 0)),
        ],
        out_specs=pl.BlockSpec((B, HEAD_PAD), lambda i: (0, 0)),
        compiler_params=pltpu.CompilerParams(
            dimension_semantics=("arbitrary",)),
    )(x, w_fc, gamma, beta, w_heads, b_heads)


@jax.jit
def recognition_forward(x, packed):
    out = _recognition_pallas(
        x,
        packed["w_fc"], packed["gamma"], packed["beta"],
        packed["w_heads"], packed["b_heads"],
    )
    digits = out[:, :N_CAT]
    mean = out[:, N_CAT:N_CAT + N_MEAN]
    variance = out[:, N_CAT + N_MEAN:N_CAT + N_MEAN + N_VAR]
    return digits, mean, variance


# ----------------------------------------------------------------------------
# Parameters in PyTorch layout (for the reference) + one-time packing into the
# kernel layout (pre-transposed fc weight, fused zero-padded head weight).
# ----------------------------------------------------------------------------
def init_params(key):
    ks = jax.random.split(key, 7)
    p = {}
    # nn.Linear weight shape is (out, in); biases are (out,)
    p["w_fc"] = 0.03 * jax.random.normal(ks[0], (D_HID, D_IN), jnp.float32)
    p["w_cat"] = 0.08 * jax.random.normal(ks[1], (N_CAT, D_HID), jnp.float32)
    p["b_cat"] = 0.05 * jax.random.normal(ks[2], (N_CAT,), jnp.float32)
    p["w_mean"] = 0.08 * jax.random.normal(ks[3], (N_MEAN, D_HID), jnp.float32)
    p["b_mean"] = 0.05 * jax.random.normal(ks[4], (N_MEAN,), jnp.float32)
    p["w_var"] = 0.08 * jax.random.normal(ks[5], (N_VAR, D_HID), jnp.float32)
    p["b_var"] = 0.05 * jax.random.normal(ks[6], (N_VAR,), jnp.float32)
    # BatchNorm1d affine params at PyTorch init: gamma=1, beta=0
    p["gamma"] = jnp.ones((D_HID,), jnp.float32)
    p["beta"] = jnp.zeros((D_HID,), jnp.float32)
    return p


def pack_params(p):
    """One-time relayout outside the jitted forward (no runtime transposes)."""
    w_heads = jnp.zeros((D_HID, HEAD_PAD), jnp.float32)
    w_heads = w_heads.at[:, :N_CAT].set(p["w_cat"].T)
    w_heads = w_heads.at[:, N_CAT:N_CAT + N_MEAN].set(p["w_mean"].T)
    w_heads = w_heads.at[:, N_CAT + N_MEAN:N_CAT + N_MEAN + N_VAR].set(p["w_var"].T)
    b_heads = jnp.zeros((HEAD_PAD,), jnp.float32)
    b_heads = b_heads.at[:N_CAT].set(p["b_cat"])
    b_heads = b_heads.at[N_CAT:N_CAT + N_MEAN].set(p["b_mean"])
    b_heads = b_heads.at[N_CAT + N_MEAN:N_CAT + N_MEAN + N_VAR].set(p["b_var"])
    return {
        "w_fc": p["w_fc"].T,                        # (1024, 128), pre-transposed
        "gamma": p["gamma"].reshape(1, D_HID),
        "beta": p["beta"].reshape(1, D_HID),
        "w_heads": w_heads,                         # (128, 128), lane-dense
        "b_heads": b_heads.reshape(1, HEAD_PAD),
    }


# ----------------------------------------------------------------------------
# Pure-JAX reference (mirrors the PyTorch forward exactly) for correctness.
# ----------------------------------------------------------------------------
def reference_forward(x, p):
    y = x @ p["w_fc"].T                                           # fc, no bias
    mu = jnp.mean(y, axis=0, keepdims=True)
    var = jnp.mean((y - mu) ** 2, axis=0, keepdims=True)
    y = (y - mu) * lax.rsqrt(var + EPS) * p["gamma"] + p["beta"]  # BatchNorm1d
    y = jnp.where(y >= 0, y, NEG_SLOPE * y)                       # LeakyReLU
    digits = y @ p["w_cat"].T + p["b_cat"]
    mean = y @ p["w_mean"].T + p["b_mean"]
    variance = jnp.exp(y @ p["w_var"].T + p["b_var"])
    return digits, mean, variance


if __name__ == "__main__":
    key = jax.random.PRNGKey(0)
    pkey, xkey = jax.random.split(key)
    params = init_params(pkey)
    packed = pack_params(params)

    # x is the output of the shared discriminator layers: (B, 1024)
    B = 8
    x = jax.random.normal(xkey, (B, D_IN), jnp.float32)

    digits, mean, variance = recognition_forward(x, packed)
    digits, mean, variance = jax.block_until_ready((digits, mean, variance))
    assert digits.shape == (B, N_CAT), digits.shape
    assert mean.shape == (B, N_MEAN), mean.shape
    assert variance.shape == (B, N_VAR), variance.shape

    r_digits, r_mean, r_var = jax.block_until_ready(reference_forward(x, params))
    assert jnp.allclose(digits, r_digits, atol=2e-4, rtol=2e-4), (
        float(jnp.max(jnp.abs(digits - r_digits))))
    assert jnp.allclose(mean, r_mean, atol=2e-4, rtol=2e-4), (
        float(jnp.max(jnp.abs(mean - r_mean))))
    assert jnp.allclose(variance, r_var, atol=2e-4, rtol=2e-4), (
        float(jnp.max(jnp.abs(variance - r_var))))

    print("KERNEL_OK")
</pallas_src>

<mosaic_0001>
module attributes {stable_mosaic.version = 11 : i64} {
  func.func @_recognition_kernel(%arg0: i32, %arg1: memref<8x1024xf32, #tpu.memory_space<vmem>>, %arg2: memref<1024x128xf32, #tpu.memory_space<vmem>>, %arg3: memref<1x128xf32, #tpu.memory_space<vmem>>, %arg4: memref<1x128xf32, #tpu.memory_space<vmem>>, %arg5: memref<128x128xf32, #tpu.memory_space<vmem>>, %arg6: memref<1x128xf32, #tpu.memory_space<vmem>>, %arg7: memref<8x128xf32, #tpu.memory_space<vmem>>) attributes {dimension_semantics = [#tpu.dimension_semantics<arbitrary>], iteration_bounds = array<i64: 1>, scalar_prefetch = 0 : i64, scratch_operands = 0 : i64, tpu.core_type = #tpu.core_type<tc>, window_params = [{pipeline_mode = #tpu.pipeline_mode<synchronous>, transform_indices = @transform_0, window_bounds = array<i64: 8, 1024>}, {pipeline_mode = #tpu.pipeline_mode<synchronous>, transform_indices = @transform_1, window_bounds = array<i64: 1024, 128>}, {pipeline_mode = #tpu.pipeline_mode<synchronous>, transform_indices = @transform_2, window_bounds = array<i64: 1, 128>}, {pipeline_mode = #tpu.pipeline_mode<synchronous>, transform_indices = @transform_3, window_bounds = array<i64: 1, 128>}, {pipeline_mode = #tpu.pipeline_mode<synchronous>, transform_indices = @transform_4, window_bounds = array<i64: 128, 128>}, {pipeline_mode = #tpu.pipeline_mode<synchronous>, transform_indices = @transform_5, window_bounds = array<i64: 1, 128>}, {pipeline_mode = #tpu.pipeline_mode<synchronous>, transform_indices = @transform_6, window_bounds = array<i64: 8, 128>}]} {
    %c0 = arith.constant 0 : index
    %c0_0 = arith.constant 0 : index
    %0 = vector.load %arg1[%c0, %c0_0] : memref<8x1024xf32, #tpu.memory_space<vmem>>, vector<8x1024xf32>
    %c0_1 = arith.constant 0 : index
    %c0_2 = arith.constant 0 : index
    %1 = vector.load %arg2[%c0_1, %c0_2] : memref<1024x128xf32, #tpu.memory_space<vmem>>, vector<1024x128xf32>
    %cst = arith.constant dense<0.000000e+00> : vector<8x128xf32>
    %2 = tpu.matmul %0, %1, %cst {dimension_numbers = #tpu.dot_dimension_numbers<[1], [0], [0], [1], [0, 0, 1, 1], [], []>} : vector<8x1024xf32>, vector<1024x128xf32>, vector<8x128xf32> -> vector<8x128xf32>
    %cst_3 = arith.constant dense<0.000000e+00> : vector<128xf32>
    %3 = vector.multi_reduction <add>, %2, %cst_3 [0] : vector<8x128xf32> to vector<128xf32>
    %4 = vector.shape_cast %3 : vector<128xf32> to vector<1x128xf32>
    %cst_4 = arith.constant 8.000000e+00 : f32
    %5 = vector.broadcast %cst_4 : f32 to vector<1x128xf32>
    %6 = arith.divf %4, %5 : vector<1x128xf32>
    %7 = vector.broadcast %6 : vector<1x128xf32> to vector<8x128xf32>
    %8 = arith.subf %2, %7 : vector<8x128xf32>
    %9 = arith.mulf %8, %8 : vector<8x128xf32>
    %cst_5 = arith.constant dense<0.000000e+00> : vector<128xf32>
    %10 = vector.multi_reduction <add>, %9, %cst_5 [0] : vector<8x128xf32> to vector<128xf32>
    %11 = vector.shape_cast %10 : vector<128xf32> to vector<1x128xf32>
    %cst_6 = arith.constant 8.000000e+00 : f32
    %12 = vector.broadcast %cst_6 : f32 to vector<1x128xf32>
    %13 = arith.divf %11, %12 : vector<1x128xf32>
    %14 = vector.broadcast %6 : vector<1x128xf32> to vector<8x128xf32>
    %15 = arith.subf %2, %14 : vector<8x128xf32>
    %cst_7 = arith.constant 9.99999974E-6 : f32
    %16 = vector.broadcast %cst_7 : f32 to vector<1x128xf32>
    %17 = arith.addf %13, %16 : vector<1x128xf32>
    %18 = math.rsqrt %17 : vector<1x128xf32>
    %19 = vector.broadcast %18 : vector<1x128xf32> to vector<8x128xf32>
    %20 = arith.mulf %15, %19 : vector<8x128xf32>
    %c0_8 = arith.constant 0 : index
    %c0_9 = arith.constant 0 : index
    %21 = vector.load %arg3[%c0_8, %c0_9] : memref<1x128xf32, #tpu.memory_space<vmem>>, vector<1x128xf32>
    %22 = vector.broadcast %21 : vector<1x128xf32> to vector<8x128xf32>
    %23 = arith.mulf %20, %22 : vector<8x128xf32>
    %c0_10 = arith.constant 0 : index
    %c0_11 = arith.constant 0 : index
    %24 = vector.load %arg4[%c0_10, %c0_11] : memref<1x128xf32, #tpu.memory_space<vmem>>, vector<1x128xf32>
    %25 = vector.broadcast %24 : vector<1x128xf32> to vector<8x128xf32>
    %26 = arith.addf %23, %25 : vector<8x128xf32>
    %cst_12 = arith.constant 1.000000e-01 : f32
    %27 = vector.broadcast %cst_12 : f32 to vector<8x128xf32>
    %28 = arith.mulf %27, %26 : vector<8x128xf32>
    %29 = arith.maximumf %26, %28 : vector<8x128xf32>
    %c0_13 = arith.constant 0 : index
    %c0_14 = arith.constant 0 : index
    %30 = vector.load %arg5[%c0_13, %c0_14] : memref<128x128xf32, #tpu.memory_space<vmem>>, vector<128x128xf32>
    %cst_15 = arith.constant dense<0.000000e+00> : vector<8x128xf32>
    %31 = tpu.matmul %29, %30, %cst_15 {dimension_numbers = #tpu.dot_dimension_numbers<[1], [0], [0], [1], [0, 0, 1, 1], [], []>} : vector<8x128xf32>, vector<128x128xf32>, vector<8x128xf32> -> vector<8x128xf32>
    %c0_16 = arith.constant 0 : index
    %c0_17 = arith.constant 0 : index
    %32 = vector.load %arg6[%c0_16, %c0_17] : memref<1x128xf32, #tpu.memory_space<vmem>>, vector<1x128xf32>
    %33 = vector.broadcast %32 : vector<1x128xf32> to vector<8x128xf32>
    %34 = arith.addf %31, %33 : vector<8x128xf32>
    %35 = tpu.iota {dimensions = array<i32: 1>} : vector<8x128xi32>
    %c12_i32 = arith.constant 12 : i32
    %36 = vector.broadcast %c12_i32 : i32 to vector<8x128xi32>
    %37 = arith.cmpi sge, %35, %36 : vector<8x128xi32>
    %c14_i32 = arith.constant 14 : i32
    %38 = vector.broadcast %c14_i32 : i32 to vector<8x128xi32>
    %39 = arith.cmpi slt, %35, %38 : vector<8x128xi32>
    %40 = arith.andi %37, %39 : vector<8x128xi1>
    %41 = math.exp %34 : vector<8x128xf32>
    %42 = arith.select %40, %41, %34 : vector<8x128xi1>, vector<8x128xf32>
    %c0_18 = arith.constant 0 : index
    %c0_19 = arith.constant 0 : index
    %43 = vector.load %arg7[%c0_18, %c0_19] : memref<8x128xf32, #tpu.memory_space<vmem>>, vector<8x128xf32>
    tpu.vector_store %arg7[%c0_18, %c0_19], %42 {strides = array<i32>} : memref<8x128xf32, #tpu.memory_space<vmem>>, vector<8x128xf32>,
    return
  }
  func.func @transform_0(%arg0: i32) -> (i32, i32) {
    %c0_i32 = arith.constant 0 : i32
    %c0_i32_0 = arith.constant 0 : i32
    %c0_i32_1 = arith.constant 0 : i32
    return %c0_i32, %c0_i32_0 : i32, i32
  }
  func.func @transform_1(%arg0: i32) -> (i32, i32) {
    %c0_i32 = arith.constant 0 : i32
    %c0_i32_0 = arith.constant 0 : i32
    %c0_i32_1 = arith.constant 0 : i32
    return %c0_i32, %c0_i32_0 : i32, i32
  }
  func.func @transform_2(%arg0: i32) -> (i32, i32) {
    %c0_i32 = arith.constant 0 : i32
    %c0_i32_0 = arith.constant 0 : i32
    %c0_i32_1 = arith.constant 0 : i32
    return %c0_i32, %c0_i32_0 : i32, i32
  }
  func.func @transform_3(%arg0: i32) -> (i32, i32) {
    %c0_i32 = arith.constant 0 : i32
    %c0_i32_0 = arith.constant 0 : i32
    %c0_i32_1 = arith.constant 0 : i32
    return %c0_i32, %c0_i32_0 : i32, i32
  }
  func.func @transform_4(%arg0: i32) -> (i32, i32) {
    %c0_i32 = arith.constant 0 : i32
    %c0_i32_0 = arith.constant 0 : i32
    %c0_i32_1 = arith.constant 0 : i32
    return %c0_i32, %c0_i32_0 : i32, i32
  }
  func.func @transform_5(%arg0: i32) -> (i32, i32) {
    %c0_i32 = arith.constant 0 : i32
    %c0_i32_0 = arith.constant 0 : i32
    %c0_i32_1 = arith.constant 0 : i32
    return %c0_i32, %c0_i32_0 : i32, i32
  }
  func.func @transform_6(%arg0: i32) -> (i32, i32) {
    %c0_i32 = arith.constant 0 : i32
    %c0_i32_0 = arith.constant 0 : i32
    %c0_i32_1 = arith.constant 0 : i32
    return %c0_i32, %c0_i32_0 : i32, i32
  }
}

</mosaic_0001>

<bundles_post_ra>
// kernel: recognition_forward.1
= control target key start
LH: loop header
LB: loop body
LE: loop exit
PB: predicated region body
PF: predicated region fallthrough
CT: control target
= control target key end

     0   :  { %11 = vsyncpa [#allocation3], 0  ;;  %s701_s0 = inlined_call_operand.hbm [shape: f32[8,1024], index: 0, kind: input, shape index: {}]   ;;  %s702_s1 = inlined_call_operand.hbm [shape: f32[1024,128], index: 1, kind: input, shape index: {}]   ;;  %s703_s2 = inlined_call_operand.vmem [shape: f32[1,128], index: 2, kind: input, shape index: {}]   ;;  %s704_s3 = inlined_call_operand.hbm [shape: f32[1,128], index: 3, kind: input, shape index: {}]   ;;  %s705_s4 = inlined_call_operand.hbm [shape: f32[128,128], index: 4, kind: input, shape index: {}]   ;;  %s706_s5 = inlined_call_operand.hbm [shape: f32[1,128], index: 5, kind: input, shape index: {}]   ;;  %s707_s6 = inlined_call_operand.vmem [shape: f32[8,128], index: 6, kind: output, shape index: {}]  }
   0x1   :  { %12 = vsyncpa [#allocation5], 0  ;;  %s29_s23 = sshll.u32 %s702_s1, 4  ;;  %s30_s23 = int_to_ptr.hbm [resolvable:$true] %s29_s23 }
   0x2   :  { %13 = vsyncpa [#allocation8], 0  ;;  %s637_s24 = smov [#allocation4]   ;;  %s55_s28 = sshll.u32 %s705_s4, 4  ;;  %s56_s28 = int_to_ptr.hbm [resolvable:$true] %s55_s28 }
   0x3   :  { %s31_s25 = sshll.u32 %s637_s24, 4  ;;  %s638_s29 = smov 128   ;;  %s32_s25 = int_to_ptr.vmem [resolvable:$true] %s31_s25 }
   0x4   :  { %s639_s30 = smov 8   ;;  %s640_s7 = smov [#allocation7]  }
   0x5   :  { %37 = dma.hbm_to_vmem [thread:$0]  %s30_s23, 16384, %s32_s25, [#allocation5], %s638_s29, %s638_s29, %s639_s30  }
   0x6   :  { %s57_s8 = sshll.u32 %s640_s7, 4  ;;  %s19_s11 = sshll.u32 %s701_s0, 4  ;;  %s58_s8 = int_to_ptr.vmem [resolvable:$true] %s57_s8  ;;  %s20_s11 = int_to_ptr.hbm [resolvable:$true] %s19_s11 }
   0x7   :  { %63 = dma.hbm_to_vmem [thread:$0]  %s56_s28, 2048, %s58_s8, [#allocation8], %s638_s29, %s638_s29, %s639_s30  }
   0x8   :  { %s45_s13 = sshll.u32 %s704_s3, 4  ;;  %s641_s14 = smov [#allocation2]   ;;  %s46_s13 = int_to_ptr.hbm [resolvable:$true] %s45_s13 }
   0x9   :  { %s21_s15 = sshll.u32 %s641_s14, 4  ;;  %s642_s4 = smov [#allocation6]   ;;  %s22_s15 = int_to_ptr.vmem [resolvable:$true] %s21_s15 }
   0xa   :  { %24 = dma.hbm_to_vmem [thread:$0]  %s20_s11, 1024, %s22_s15, [#allocation3]  }
   0xb   :  { %s47_s16 = sshll.u32 %s642_s4, 4  ;;  %s69_s19 = sshll.u32 %s706_s5, 4  ;;  %s48_s16 = int_to_ptr.vmem [resolvable:$true] %s47_s16  ;;  %s70_s19 = int_to_ptr.hbm [resolvable:$true] %s69_s19 }
   0xc   :  { %50 = dma.hbm_to_vmem [thread:$0]  %s46_s13, 16, %s48_s16, [#allocation5]  }
   0xd   :  { %s643_s0 = smov [#allocation9]  }
   0xe   :  { %s71_s20 = sshll.u32 %s643_s0, 4  ;;  %s72_s20 = int_to_ptr.vmem [resolvable:$true] %s71_s20 }
   0xf   :  { %74 = dma.hbm_to_vmem [thread:$0]  %s70_s19, 16, %s72_s20, [#allocation8]  }
  0x10   :  { %631 = dma.done.wait [#allocation3], 1024  }
  0x11   :  { %632 = vsyncadd [#allocation3], 4294966272 }
  0x12   :  { %633 = dma.done.wait [#allocation5], 16400  }
  0x13   :  { %634 = vsyncadd [#allocation5], 4294950896 }
  0x14   :  { %635 = dma.done.wait [#allocation8], 2064  }
  0x15   :  { %636 = vsyncadd [#allocation8], 4294965232  ;;  %v118_v0 = vld [vmem:[#allocation4 + $0x78] sm:$0xff]  ;;  %v117_v2 = vld [vmem:[#allocation4 + $0x70] sm:$0xff] }
  0x16   :  { %v150_v1 = vld [vmem:[#allocation4 + $0x178] sm:$0xff]  ;;  %231 = vmatpush.msra.mxu0 %v118_v0  ;;  %v149_v4 = vld [vmem:[#allocation4 + $0x170] sm:$0xff]  ;;  %v116_v6 = vld [vmem:[#allocation4 + $0x68] sm:$0xff] }
  0x17   :  { %271 = vmatpush.msra.mxu2 %v150_v1  ;;  %v134_v3 = vld [vmem:[#allocation4 + $0xf8] sm:$0xff]  ;;  %v133_v7 = vld [vmem:[#allocation4 + $0xf0] sm:$0xff]  ;;  %v148_v8 = vld [vmem:[#allocation4 + $0x168] sm:$0xff] }
  0x18   :  { %v166_v5 = vld [vmem:[#allocation4 + $0x1f8] sm:$0xff]  ;;  %251 = vmatpush.msra.mxu1 %v134_v3  ;;  %232 = vmatpush.msra.mxu0 %v117_v2  ;;  %v165_v9 = vld [vmem:[#allocation4 + $0x1f0] sm:$0xff]  ;;  %v132_v10 = vld [vmem:[#allocation4 + $0xe8] sm:$0xff] }
  0x19   :  { %291 = vmatpush.msra.mxu3 %v166_v5  ;;  %272 = vmatpush.msra.mxu2 %v149_v4  ;;  %v115_v11 = vld [vmem:[#allocation4 + $0x60] sm:$0xff]  ;;  %v164_v13 = vld [vmem:[#allocation4 + $0x1e8] sm:$0xff]  ;;  %v114_v16 = vld [vmem:[#allocation4 + $0x58] sm:$0xff] }
  0x1a   :  { %252 = vmatpush.msra.mxu1 %v133_v7  ;;  %v147_v12 = vld [vmem:[#allocation4 + $0x160] sm:$0xff]  ;;  %233 = vmatpush.msra.mxu0 %v116_v6  ;;  %v146_v17 = vld [vmem:[#allocation4 + $0x158] sm:$0xff]  ;;  %v113_v20 = vld [vmem:[#allocation4 + $0x50] sm:$0xff] }
  0x1b   :  { %292 = vmatpush.msra.mxu3 %v165_v9  ;;  %273 = vmatpush.msra.mxu2 %v148_v8  ;;  %v131_v14 = vld [vmem:[#allocation4 + $0xe0] sm:$0xff]  ;;  %v130_v18 = vld [vmem:[#allocation4 + $0xd8] sm:$0xff]  ;;  %v145_v21 = vld [vmem:[#allocation4 + $0x150] sm:$0xff] }
  0x1c   :  { %v163_v15 = vld [vmem:[#allocation4 + $0x1e0] sm:$0xff]  ;;  %253 = vmatpush.msra.mxu1 %v132_v10  ;;  %234 = vmatpush.msra.mxu0 %v115_v11  ;;  %v162_v19 = vld [vmem:[#allocation4 + $0x1d8] sm:$0xff]  ;;  %v129_v22 = vld [vmem:[#allocation4 + $0xd0] sm:$0xff] }
  0x1d   :  { %293 = vmatpush.msra.mxu3 %v164_v13  ;;  %274 = vmatpush.msra.mxu2 %v147_v12  ;;  %v161_v23 = vld [vmem:[#allocation4 + $0x1d0] sm:$0xff]  ;;  %v112_v24 = vld [vmem:[#allocation4 + $0x48] sm:$0xff]  ;;  %v111_v28 = vld [vmem:[#allocation4 + $0x40] sm:$0xff] }
  0x1e   :  { %254 = vmatpush.msra.mxu1 %v131_v14  ;;  %235 = vmatpush.msra.mxu0 %v114_v16  ;;  %v144_v25 = vld [vmem:[#allocation4 + $0x148] sm:$0xff]  ;;  %v143_v29 = vld [vmem:[#allocation4 + $0x140] sm:$0xff]  ;;  %v110_v32 = vld [vmem:[#allocation4 + $0x38] sm:$0xff] }
  0x1f   :  { %294 = vmatpush.msra.mxu3 %v163_v15  ;;  %275 = vmatpush.msra.mxu2 %v146_v17  ;;  %v128_v26 = vld [vmem:[#allocation4 + $0xc8] sm:$0xff]  ;;  %v127_v30 = vld [vmem:[#allocation4 + $0xc0] sm:$0xff]  ;;  %v142_v33 = vld [vmem:[#allocation4 + $0x138] sm:$0xff] }
  0x20   :  { %255 = vmatpush.msra.mxu1 %v130_v18  ;;  %236 = vmatpush.msra.mxu0 %v113_v20  ;;  %v160_v27 = vld [vmem:[#allocation4 + $0x1c8] sm:$0xff]  ;;  %v159_v31 = vld [vmem:[#allocation4 + $0x1c0] sm:$0xff]  ;;  %v126_v34 = vld [vmem:[#allocation4 + $0xb8] sm:$0xff] }
  0x21   :  { %295 = vmatpush.msra.mxu3 %v162_v19  ;;  %276 = vmatpush.msra.mxu2 %v145_v21  ;;  %v158_v35 = vld [vmem:[#allocation4 + $0x1b8] sm:$0xff]  ;;  %v109_v36 = vld [vmem:[#allocation4 + $0x30] sm:$0xff]  ;;  %v108_v40 = vld [vmem:[#allocation4 + $0x28] sm:$0xff] }
  0x22   :  { %256 = vmatpush.msra.mxu1 %v129_v22  ;;  %237 = vmatpush.msra.mxu0 %v112_v24  ;;  %v141_v37 = vld [vmem:[#allocation4 + $0x130] sm:$0xff]  ;;  %v140_v41 = vld [vmem:[#allocation4 + $0x128] sm:$0xff]  ;;  %v107_v44 = vld [vmem:[#allocation4 + $0x20] sm:$0xff] }
  0x23   :  { %296 = vmatpush.msra.mxu3 %v161_v23  ;;  %277 = vmatpush.msra.mxu2 %v144_v25  ;;  %v125_v38 = vld [vmem:[#allocation4 + $0xb0] sm:$0xff]  ;;  %v124_v42 = vld [vmem:[#allocation4 + $0xa8] sm:$0xff]  ;;  %v139_v45 = vld [vmem:[#allocation4 + $0x120] sm:$0xff] }
  0x24   :  { %257 = vmatpush.msra.mxu1 %v128_v26  ;;  %238 = vmatpush.msra.mxu0 %v111_v28  ;;  %v157_v39 = vld [vmem:[#allocation4 + $0x1b0] sm:$0xff]  ;;  %v156_v43 = vld [vmem:[#allocation4 + $0x1a8] sm:$0xff]  ;;  %v123_v46 = vld [vmem:[#allocation4 + $0xa0] sm:$0xff] }
  0x25   :  { %297 = vmatpush.msra.mxu3 %v160_v27  ;;  %278 = vmatpush.msra.mxu2 %v143_v29  ;;  %v155_v47 = vld [vmem:[#allocation4 + $0x1a0] sm:$0xff]  ;;  %v106_v48 = vld [vmem:[#allocation4 + $0x18] sm:$0xff]  ;;  %v105_v52 = vld [vmem:[#allocation4 + $0x10] sm:$0xff] }
  0x26   :  { %258 = vmatpush.msra.mxu1 %v127_v30  ;;  %239 = vmatpush.msra.mxu0 %v110_v32  ;;  %v138_v49 = vld [vmem:[#allocation4 + $0x118] sm:$0xff]  ;;  %v137_v53 = vld [vmem:[#allocation4 + $0x110] sm:$0xff]  ;;  %v104_v56 = vld [vmem:[#allocation4 + $0x8] sm:$0xff] }
  0x27   :  { %298 = vmatpush.msra.mxu3 %v159_v31  ;;  %279 = vmatpush.msra.mxu2 %v142_v33  ;;  %v122_v50 = vld [vmem:[#allocation4 + $0x98] sm:$0xff]  ;;  %v121_v54 = vld [vmem:[#allocation4 + $0x90] sm:$0xff]  ;;  %v136_v57 = vld [vmem:[#allocation4 + $0x108] sm:$0xff] }
  0x28   :  { %259 = vmatpush.msra.mxu1 %v126_v34  ;;  %240 = vmatpush.msra.mxu0 %v109_v36  ;;  %v154_v51 = vld [vmem:[#allocation4 + $0x198] sm:$0xff]  ;;  %v153_v55 = vld [vmem:[#allocation4 + $0x190] sm:$0xff]  ;;  %v120_v58 = vld [vmem:[#allocation4 + $0x88] sm:$0xff] }
  0x29   :  { %299 = vmatpush.msra.mxu3 %v158_v35  ;;  %280 = vmatpush.msra.mxu2 %v141_v37  ;;  %v152_v59 = vld [vmem:[#allocation4 + $0x188] sm:$0xff]  ;;  %v103_v60 = vld [vmem:[#allocation4] sm:$0xff]  ;;  %v182_v62 = vld [vmem:[#allocation4 + $0x278] sm:$0xff] }
  0x2a   :  { %260 = vmatpush.msra.mxu1 %v125_v38  ;;  %241 = vmatpush.msra.mxu0 %v108_v40  ;;  %v135_v61 = vld [vmem:[#allocation4 + $0x100] sm:$0xff]  ;;  %v214_v63 = vld [vmem:[#allocation4 + $0x378] sm:$0xff]  ;;  %v181_v2 = vld [vmem:[#allocation4 + $0x270] sm:$0xff] }
  0x2b   :  { %300 = vmatpush.msra.mxu3 %v157_v39  ;;  %281 = vmatpush.msra.mxu2 %v140_v41  ;;  %v119_v0 = vld [vmem:[#allocation4 + $0x80] sm:$0xff]  ;;  %v198_v3 = vld [vmem:[#allocation4 + $0x2f8] sm:$0xff]  ;;  %v213_v4 = vld [vmem:[#allocation4 + $0x370] sm:$0xff] }
  0x2c   :  { %261 = vmatpush.msra.mxu1 %v124_v42  ;;  %242 = vmatpush.msra.mxu0 %v107_v44  ;;  %v151_v1 = vld [vmem:[#allocation4 + $0x180] sm:$0xff]  ;;  %v230_v5 = vld [vmem:[#allocation4 + $0x3f8] sm:$0xff]  ;;  %v180_v6 = vld [vmem:[#allocation4 + $0x268] sm:$0xff] }
  0x2d   :  { %301 = vmatpush.msra.mxu3 %v156_v43  ;;  %282 = vmatpush.msra.mxu2 %v139_v45  ;;  %v197_v7 = vld [vmem:[#allocation4 + $0x2f0] sm:$0xff]  ;;  %v212_v8 = vld [vmem:[#allocation4 + $0x368] sm:$0xff]  ;;  %v179_v10 = vld [vmem:[#allocation4 + $0x260] sm:$0xff] }
  0x2e   :  { %262 = vmatpush.msra.mxu1 %v123_v46  ;;  %243 = vmatpush.msra.mxu0 %v106_v48  ;;  %v229_v9 = vld [vmem:[#allocation4 + $0x3f0] sm:$0xff]  ;;  %v196_v11 = vld [vmem:[#allocation4 + $0x2e8] sm:$0xff]  ;;  %v211_v12 = vld [vmem:[#allocation4 + $0x360] sm:$0xff] }
  0x2f   :  { %302 = vmatpush.msra.mxu3 %v155_v47  ;;  %283 = vmatpush.msra.mxu2 %v138_v49  ;;  %v228_v13 = vld [vmem:[#allocation4 + $0x3e8] sm:$0xff]  ;;  %v178_v14 = vld [vmem:[#allocation4 + $0x258] sm:$0xff]  ;;  %v195_v15 = vld [vmem:[#allocation4 + $0x2e0] sm:$0xff] }
  0x30   :  { %263 = vmatpush.msra.mxu1 %v122_v50  ;;  %244 = vmatpush.msra.mxu0 %v105_v52  ;;  %v210_v16 = vld [vmem:[#allocation4 + $0x358] sm:$0xff]  ;;  %v227_v17 = vld [vmem:[#allocation4 + $0x3e0] sm:$0xff]  ;;  %v177_v18 = vld [vmem:[#allocation4 + $0x250] sm:$0xff] }
  0x31   :  { %303 = vmatpush.msra.mxu3 %v154_v51  ;;  %284 = vmatpush.msra.mxu2 %v137_v53  ;;  %v194_v19 = vld [vmem:[#allocation4 + $0x2d8] sm:$0xff]  ;;  %v209_v20 = vld [vmem:[#allocation4 + $0x350] sm:$0xff]  ;;  %v176_v22 = vld [vmem:[#allocation4 + $0x248] sm:$0xff] }
  0x32   :  { %264 = vmatpush.msra.mxu1 %v121_v54  ;;  %245 = vmatpush.msra.mxu0 %v104_v56  ;;  %v226_v21 = vld [vmem:[#allocation4 + $0x3d8] sm:$0xff]  ;;  %v193_v23 = vld [vmem:[#allocation4 + $0x2d0] sm:$0xff]  ;;  %v208_v24 = vld [vmem:[#allocation4 + $0x348] sm:$0xff] }
  0x33   :  { %304 = vmatpush.msra.mxu3 %v153_v55  ;;  %285 = vmatpush.msra.mxu2 %v136_v57  ;;  %v225_v25 = vld [vmem:[#allocation4 + $0x3d0] sm:$0xff]  ;;  %v175_v26 = vld [vmem:[#allocation4 + $0x240] sm:$0xff]  ;;  %v192_v27 = vld [vmem:[#allocation4 + $0x2c8] sm:$0xff] }
  0x34   :  { %265 = vmatpush.msra.mxu1 %v120_v58  ;;  %246 = vmatpush.msra.mxu0 %v103_v60  ;;  %v207_v28 = vld [vmem:[#allocation4 + $0x340] sm:$0xff]  ;;  %v224_v29 = vld [vmem:[#allocation4 + $0x3c8] sm:$0xff]  ;;  %v174_v30 = vld [vmem:[#allocation4 + $0x238] sm:$0xff] }
  0x35   :  { %305 = vmatpush.msra.mxu3 %v152_v59  ;;  %286 = vmatpush.msra.mxu2 %v135_v61  ;;  %v191_v31 = vld [vmem:[#allocation4 + $0x2c0] sm:$0xff]  ;;  %v206_v32 = vld [vmem:[#allocation4 + $0x338] sm:$0xff]  ;;  %v173_v34 = vld [vmem:[#allocation4 + $0x230] sm:$0xff] }
  0x36   :  { %311 = vmatpush.msrb.mxu0 %v182_v62  ;;  %266 = vmatpush.msra.mxu1 %v119_v0  ;;  %v223_v33 = vld [vmem:[#allocation4 + $0x3c0] sm:$0xff]  ;;  %v190_v35 = vld [vmem:[#allocation4 + $0x2b8] sm:$0xff]  ;;  %v205_v36 = vld [vmem:[#allocation4 + $0x330] sm:$0xff] }
  0x37   :  { %351 = vmatpush.msrb.mxu2 %v214_v63  ;;  %306 = vmatpush.msra.mxu3 %v151_v1  ;;  %v222_v37 = vld [vmem:[#allocation4 + $0x3b8] sm:$0xff]  ;;  %v172_v38 = vld [vmem:[#allocation4 + $0x228] sm:$0xff]  ;;  %v189_v39 = vld [vmem:[#allocation4 + $0x2b0] sm:$0xff] }
  0x38   :  { %312 = vmatpush.msrb.mxu0 %v181_v2  ;;  %331 = vmatpush.msrb.mxu1 %v198_v3  ;;  %v204_v40 = vld [vmem:[#allocation4 + $0x328] sm:$0xff]  ;;  %v221_v41 = vld [vmem:[#allocation4 + $0x3b0] sm:$0xff]  ;;  %v171_v43 = vld [vmem:[#allocation4 + $0x220] sm:$0xff] }
  0x39   :  { %352 = vmatpush.msrb.mxu2 %v213_v4  ;;  %371 = vmatpush.msrb.mxu3 %v230_v5  ;;  %v97_v42 = vld [vmem:[#allocation2 + $0x10] sm:$0xff]  ;;  %v188_v44 = vld [vmem:[#allocation4 + $0x2a8] sm:$0xff]  ;;  %v203_v45 = vld [vmem:[#allocation4 + $0x320] sm:$0xff] }
  0x3a   :  { %313 = vmatpush.msrb.mxu0 %v180_v6  ;;  %332 = vmatpush.msrb.mxu1 %v197_v7  ;;  %v220_v46 = vld [vmem:[#allocation4 + $0x3a8] sm:$0xff]  ;;  %v95_v47 = vld [vmem:[#allocation2] sm:$0xff]  ;;  %v98_v48 = vld [vmem:[#allocation2 + $0x18] sm:$0xff] }
  0x3b   :  { %353 = vmatpush.msrb.mxu2 %v212_v8  ;;  %372 = vmatpush.msrb.mxu3 %v229_v9  ;;  %v170_v49 = vld [vmem:[#allocation4 + $0x218] sm:$0xff]  ;;  %v187_v50 = vld [vmem:[#allocation4 + $0x2a0] sm:$0xff]  ;;  %v96_v53 = vld [vmem:[#allocation2 + $0x8] sm:$0xff] }
  0x3c   :  { %314 = vmatpush.msrb.mxu0 %v179_v10  ;;  %333 = vmatpush.msrb.mxu1 %v196_v11  ;;  %v202_v51 = vld [vmem:[#allocation4 + $0x318] sm:$0xff]  ;;  %v219_v52 = vld [vmem:[#allocation4 + $0x3a0] sm:$0xff]  ;;  %v169_v54 = vld [vmem:[#allocation4 + $0x210] sm:$0xff] }
  0x3d   :  { %354 = vmatpush.msrb.mxu2 %v211_v12  ;;  %373 = vmatpush.msrb.mxu3 %v228_v13  ;;  %v186_v55 = vld [vmem:[#allocation4 + $0x298] sm:$0xff]  ;;  %v201_v56 = vld [vmem:[#allocation4 + $0x310] sm:$0xff]  ;;  %v168_v58 = vld [vmem:[#allocation4 + $0x208] sm:$0xff]  ;;  %v644_v12 = vmov 8.0  }
  0x3e   :  { %315 = vmatpush.msrb.mxu0 %v178_v14  ;;  %334 = vmatpush.msrb.mxu1 %v195_v15  ;;  %v218_v57 = vld [vmem:[#allocation4 + $0x398] sm:$0xff]  ;;  %v185_v59 = vld [vmem:[#allocation4 + $0x290] sm:$0xff]  ;;  %v200_v60 = vld [vmem:[#allocation4 + $0x308] sm:$0xff]  ;;  %505 = vrcp.f32 %v644_v12 }
  0x3f   :  { %355 = vmatpush.msrb.mxu2 %v210_v16  ;;  %374 = vmatpush.msrb.mxu3 %v227_v17  ;;  %v217_v61 = vld [vmem:[#allocation4 + $0x390] sm:$0xff]  ;;  %v167_v62 = vld [vmem:[#allocation4 + $0x200] sm:$0xff]  ;;  %v184_v63 = vld [vmem:[#allocation4 + $0x288] sm:$0xff] }
  0x40   :  { %316 = vmatpush.msrb.mxu0 %v177_v18  ;;  %335 = vmatpush.msrb.mxu1 %v194_v19  ;;  %v199_v0 = vld [vmem:[#allocation4 + $0x300] sm:$0xff]  ;;  %v216_v1 = vld [vmem:[#allocation4 + $0x388] sm:$0xff]  ;;  %v101_v3 = vld [vmem:[#allocation2 + $0x30] sm:$0xff] }
  0x41   :  { %356 = vmatpush.msrb.mxu2 %v209_v20  ;;  %375 = vmatpush.msrb.mxu3 %v226_v21  ;;  %v99_v2 = vld [vmem:[#allocation2 + $0x20] sm:$0xff]  ;;  %v100_v6 = vld [vmem:[#allocation2 + $0x28] sm:$0xff]  ;;  %v102_v7 = vld [vmem:[#allocation2 + $0x38] sm:$0xff] }
  0x42   :  { %317 = vmatpush.msrb.mxu0 %v176_v22  ;;  %336 = vmatpush.msrb.mxu1 %v193_v23  ;;  %v183_v4 = vld [vmem:[#allocation4 + $0x280] sm:$0xff] }
  0x43   :  { %357 = vmatpush.msrb.mxu2 %v208_v24  ;;  %376 = vmatpush.msrb.mxu3 %v225_v25  ;;  %v215_v5 = vld [vmem:[#allocation4 + $0x380] sm:$0xff] }
  0x44   :  { %318 = vmatpush.msrb.mxu0 %v175_v26  ;;  %337 = vmatpush.msrb.mxu1 %v192_v27  ;;  %v506_v17 = vpop.eup %505  ;;  %v453_v27 = vld [vmem:[#allocation7 + $0x78] sm:$0xff] }
  0x45   :  { %358 = vmatpush.msrb.mxu2 %v207_v28  ;;  %377 = vmatpush.msrb.mxu3 %v224_v29  ;;  %v398_v20 = vmul.f32 8.0, %v506_v17  ;;  %v452_v29 = vld [vmem:[#allocation7 + $0x70] sm:$0xff]  ;;  %vm402_vm0 = vweird.f32 %v506_v17 }
  0x46   :  { %319 = vmatpush.msrb.mxu0 %v174_v30  ;;  %338 = vmatpush.msrb.mxu1 %v191_v31 }
  0x47   :  { %359 = vmatpush.msrb.mxu2 %v206_v32  ;;  %378 = vmatpush.msrb.mxu3 %v223_v33  ;;  %v399_v25 = vsub.f32 1.0, %v398_v20  ;;  %v451_v32 = vld [vmem:[#allocation7 + $0x68] sm:$0xff] }
  0x48   :  { %320 = vmatpush.msrb.mxu0 %v173_v34  ;;  %339 = vmatpush.msrb.mxu1 %v190_v35  ;;  %v450_v34 = vld [vmem:[#allocation7 + $0x60] sm:$0xff] }
  0x49   :  { %360 = vmatpush.msrb.mxu2 %v205_v36  ;;  %379 = vmatpush.msrb.mxu3 %v222_v37  ;;  %v400_v30 = vmul.f32 %v506_v17, %v399_v25  ;;  %v449_v37 = vld [vmem:[#allocation7 + $0x58] sm:$0xff] }
  0x4a   :  { %321 = vmatpush.msrb.mxu0 %v172_v38  ;;  %340 = vmatpush.msrb.mxu1 %v189_v39  ;;  %v448_v39 = vld [vmem:[#allocation7 + $0x50] sm:$0xff] }
  0x4b   :  { %361 = vmatpush.msrb.mxu2 %v204_v40  ;;  %380 = vmatpush.msrb.mxu3 %v221_v41  ;;  %v401_v35 = vadd.f32 %v506_v17, %v400_v30 }
  0x4c   :  { %287 = vmatmul.f32.vlgmr.msra.gmra.mxu2 %v97_v42  ;;  %322 = vmatpush.msrb.mxu0 %v171_v43  ;;  %v447_v42 = vld [vmem:[#allocation7 + $0x48] sm:$0xff] }
  0x4d   :  { %341 = vmatpush.msrb.mxu1 %v188_v44  ;;  %362 = vmatpush.msrb.mxu2 %v203_v45  ;;  %v403_v40 = vsel %vm402_vm0, %v506_v17, %v401_v35  ;;  %v446_v44 = vld [vmem:[#allocation7 + $0x40] sm:$0xff] }
  0x4e   :  { %381 = vmatpush.msrb.mxu3 %v220_v46  ;;  %247 = vmatmul.f32.vlgmr.msra.gmra.mxu0 %v95_v47  ;;  %v445_v46 = vld [vmem:[#allocation7 + $0x38] sm:$0xff] }
  0x4f   :  { %307 = vmatmul.f32.vlgmr.msra.gmra.mxu3 %v98_v48  ;;  %323 = vmatpush.msrb.mxu0 %v170_v49  ;;  %v444_v48 = vld [vmem:[#allocation7 + $0x30] sm:$0xff] }
  0x50   :  { %342 = vmatpush.msrb.mxu1 %v187_v50  ;;  %363 = vmatpush.msrb.mxu2 %v202_v51  ;;  %v443_v50 = vld [vmem:[#allocation7 + $0x28] sm:$0xff] }
  0x51   :  { %382 = vmatpush.msrb.mxu3 %v219_v52  ;;  %267 = vmatmul.f32.vlgmr.msra.gmra.mxu1 %v96_v53  ;;  %v442_v52 = vld [vmem:[#allocation7 + $0x20] sm:$0xff] }
  0x52   :  { %324 = vmatpush.msrb.mxu0 %v169_v54  ;;  %343 = vmatpush.msrb.mxu1 %v186_v55  ;;  %v441_v54 = vld [vmem:[#allocation7 + $0x18] sm:$0xff]  ;;  %v440_v55 = vld [vmem:[#allocation7 + $0x10] sm:$0xff] }
  0x53   :  { %364 = vmatpush.msrb.mxu2 %v201_v56  ;;  %383 = vmatpush.msrb.mxu3 %v218_v57  ;;  %v439_v57 = vld [vmem:[#allocation7 + $0x8] sm:$0xff] }
  0x54   :  { %325 = vmatpush.msrb.mxu0 %v168_v58  ;;  %344 = vmatpush.msrb.mxu1 %v185_v59  ;;  %v438_v59 = vld [vmem:[#allocation7] sm:$0xff] }
  0x55   :  { %365 = vmatpush.msrb.mxu2 %v200_v60  ;;  %384 = vmatpush.msrb.mxu3 %v217_v61 }
  0x56   :  { %326 = vmatpush.msrb.mxu0 %v167_v62  ;;  %345 = vmatpush.msrb.mxu1 %v184_v63 }
  0x57   :  { %366 = vmatpush.msrb.mxu2 %v199_v0  ;;  %385 = vmatpush.msrb.mxu3 %v216_v1 }
  0x58   :  { %327 = vmatmul.f32.vlgmr.msrb.gmra.mxu0 %v99_v2  ;;  %367 = vmatmul.f32.vlgmr.msrb.gmra.mxu2 %v101_v3 }
  0x59   :  { %346 = vmatpush.msrb.mxu1 %v183_v4  ;;  %386 = vmatpush.msrb.mxu3 %v215_v5  ;;  %v502_v5 = vld [vmem:[%s703_s2] ss:$0 sm:$0xff] }
  0x5a   :  { %347 = vmatmul.f32.vlgmr.msrb.gmra.mxu1 %v100_v6  ;;  %387 = vmatmul.f32.vlgmr.msrb.gmra.mxu3 %v102_v7 }
  0x5b   :  { %458 = vmatpush.msra.mxu0 %v453_v27 }
  0x5d   :  { %459 = vmatpush.msra.mxu0 %v452_v29 }
  0x5f   :  { %460 = vmatpush.msra.mxu0 %v451_v32 }
  0x61   :  { %461 = vmatpush.msra.mxu0 %v450_v34 }
  0x63   :  { %462 = vmatpush.msra.mxu0 %v449_v37 }
  0x65   :  { %463 = vmatpush.msra.mxu0 %v448_v39 }
  0x67   :  { %464 = vmatpush.msra.mxu0 %v447_v42 }
  0x69   :  { %465 = vmatpush.msra.mxu0 %v446_v44 }
  0x6b   :  { %466 = vmatpush.msra.mxu0 %v445_v46 }
  0x6d   :  { %467 = vmatpush.msra.mxu0 %v444_v48 }
  0x6f   :  { %468 = vmatpush.msra.mxu0 %v443_v50 }
  0x71   :  { %469 = vmatpush.msra.mxu0 %v442_v52 }
  0x73   :  { %470 = vmatpush.msra.mxu0 %v441_v54 }
  0x75   :  { %471 = vmatpush.msra.mxu0 %v440_v55 }
  0x77   :  { %472 = vmatpush.msra.mxu0 %v439_v57 }
  0x79   :  { %473 = vmatpush.msra.mxu0 %v438_v59 }
  0xcb   :  { %v248_v8 = vpop.f32.mrf.mxu0 }
  0xce   :  { %v268_v9 = vpop.f32.mrf.mxu1 }
  0xcf   :  { %v269_v10 = vadd.f32 %v268_v9, %v248_v8  ;;  %v288_v11 = vpop.f32.mrf.mxu2  ;;  %v503_v8 = vld [vmem:[#allocation6] ss:$0 sm:$0xff] }
  0xd1   :  { %v289_v13 = vadd.f32 %v288_v11, %v269_v10 }
  0xd2   :  { %v308_v14 = vpop.f32.mrf.mxu3 }
  0xd3   :  { %v309_v15 = vadd.f32 %v308_v14, %v289_v13  ;;  %v504_v13 = vld [vmem:[#allocation9] ss:$0 sm:$0xff]  ;;  %v478_v14 = vlaneseq }
  0xd5   :  { %v328_v16 = vpop.f32.mrf.mxu0  ;;  %v479_v17 = vand.u32 127, %v478_v14 }
  0xd6   :  { %v329_v18 = vadd.f32 %v328_v16, %v309_v15 }
  0xd7   :  { %v348_v19 = vpop.f32.mrf.mxu1  ;;  %vm480_vm4 = vcmp.ge.s32.totalorder %v479_v17, 12  ;;  %vm481_vm5 = vcmp.lt.s32.totalorder %v479_v17, 14 }
  0xd8   :  { %v349_v21 = vadd.f32 %v348_v19, %v329_v18  ;;  %vm482_vm6 = vmand %vm480_vm4, %vm481_vm5 }
  0xdb   :  { %v368_v22 = vpop.f32.mrf.mxu2 }
  0xdc   :  { %v369_v23 = vadd.f32 %v368_v22, %v349_v21 }
  0xdd   :  { %v388_v24 = vpop.f32.mrf.mxu3 }
  0xde   :  { %v389_v26 = vadd.f32 %v388_v24, %v369_v23 }
  0xe0   :  { %v391_v28 = vrot.slane %v389_v26, 4 }
  0xe2   :  { %v392_v31 = vadd.f32 %v391_v28, %v389_v26 }
  0xe4   :  { %v393_v33 = vrot.slane %v392_v31, 2 }
  0xe6   :  { %v394_v36 = vadd.f32 %v393_v33, %v392_v31 }
  0xe8   :  { %v395_v38 = vrot.slane %v394_v36, 1 }
  0xea   :  { %v396_v41 = vadd.f32 %v395_v38, %v394_v36 }
  0xec   :  { %v404_v43 = vmul.f32 %v403_v40, %v396_v41 }
  0xee   :  { %v405_v45 = vsub.f32 %v389_v26, %v404_v43 }
  0xf0   :  { %v406_v47 = vmul.f32 %v405_v45, %v405_v45 }
  0xf2   :  { %v407_v49 = vrot.slane %v406_v47, 4 }
  0xf4   :  { %v408_v51 = vadd.f32 %v407_v49, %v406_v47 }
  0xf6   :  { %v409_v53 = vrot.slane %v408_v51, 2 }
  0xf8   :  { %v410_v56 = vadd.f32 %v409_v53, %v408_v51 }
  0xfa   :  { %v411_v58 = vrot.slane %v410_v56, 1 }
  0xfc   :  { %v412_v60 = vadd.f32 %v411_v58, %v410_v56 }
  0xfe   :  { %v413_v61 = vmul.f32 %v412_v60, %v403_v40 }
 0x100   :  { %v414_v62 = vadd.f32 1e-05, %v413_v61 }
 0x102   :  { %507 = vrsqrt.f32 %v414_v62  ;;  %vm421_vm2 = vweird.f32 %v414_v62 }
 0x108   :  { %v508_v63 = vpop.eup %507 }
 0x109   :  { %v416_v0 = vmul.f32 %v508_v63, %v414_v62  ;;  %vm422_vm1 = vweird.f32 %v508_v63 }
 0x10a   :  { %vm423_vm3 = vmor %vm421_vm2, %vm422_vm1 }
 0x10b   :  { %v417_v1 = vmul.f32 %v508_v63, %v416_v0 }
 0x10d   :  { %v418_v2 = vmul.f32 0.5, %v417_v1 }
 0x10f   :  { %v419_v3 = vsub.f32 1.5, %v418_v2 }
 0x111   :  { %v420_v4 = vmul.f32 %v508_v63, %v419_v3 }
 0x113   :  { %v424_v6 = vsel %vm423_vm3, %v508_v63, %v420_v4 }
 0x114   :  { %v425_v7 = vmul.f32 %v424_v6, %v405_v45 }
 0x116   :  { %v430_v9 = vmul.f32 %v502_v5, %v425_v7 }
 0x118   :  { %v435_v10 = vadd.f32 %v503_v8, %v430_v9 }
 0x11a   :  { %v436_v11 = vmul.f32 0.1, %v435_v10 }
 0x11c   :  { %v437_v12 = vmax.f32 %v435_v10, %v436_v11 }
 0x11e   :  { %474 = vmatmul.f32.vlgmr.msra.gmra.mxu0 %v437_v12 }
 0x19b   :  { %v475_v15 = vpop.f32.mrf.mxu0 }
 0x19c   :  { %v476_v16 = vadd.f32 %v504_v13, %v475_v15 }
 0x19e   :  { %v483_v18 = vmul.f32 1.442695, %v476_v16 }
 0x1a0   :  { %509 = vpow2.f32 %v483_v18 }
 0x1a6   :  { %v510_v19 = vpop.eup %509 }
 0x1a7   :  { %v485_v20 = vsel %vm482_vm6, %v510_v19, %v476_v16 }
 0x1a8   :  { %486 = vst [vmem:[%s707_s6] sm:$0xff] %v485_v20 }
 0x1a9   :  { %491 = vsyncpa [#allocation3], 1 }
 0x1aa   :  { %492 = vsyncpa [#allocation5], 1 }
 0x1ab   :  { %493 = vsyncpa [#allocation8], 1 }

</bundles_post_ra>
